<compile_context>
chip_gen: v7x
topology: tpu7x:2x2x1
jax: 0.10.0
libtpu: 0.0.40
codegen_flags: <defaults>
</compile_context>

<pallas_src>
import jax
import jax.numpy as jnp
from jax.experimental import pallas as pl
from jax.experimental.pallas import tpu as pltpu

LANE = 128


def mlp_kernel(xT_ref, w1_ref, b1_ref, w2c_ref, b2_ref,
               out_ref, h1_ref, h2_ref):
    xT = xT_ref[...]                       # (2, TILE)  batch on lanes
    w1 = w1_ref[...]                       # (8, 2)
    b1 = b1_ref[...]                       # (8, 1)

    # Layer 1: hidden1 = W1 @ x^T + b1; K=2 contraction as two broadcast FMAs
    # on the VPU (outer-product broadcasts, no MXU).
    h1 = w1[:, 0:1] * xT[0:1, :] + w1[:, 1:2] * xT[1:2, :] + b1   # (8, TILE)
    h2 = jnp.maximum(h1, 0.0)                                      # ReLU

    h1_ref[...] = h1.astype(h1_ref.dtype)
    h2_ref[...] = h2.astype(h2_ref.dtype)

    # Layer 2: output = W2 @ hidden2 + b2; K=8 contraction as a broadcast
    # multiply + 8-sublane reduce (XLU) + scalar bias from SMEM.
    w2c = w2c_ref[...]                     # (8, 1) column
    y = jnp.sum(w2c * h2, axis=0, keepdims=True) + b2_ref[0, 0]    # (1, TILE)
    out_ref[...] = y.astype(out_ref.dtype)


def _round_up(n, m):
    return ((n + m - 1) // m) * m


def _default_target_tile():
    """Generation-aware lane-tile target (safe fallback = 32768)."""
    try:
        vmem = pltpu.get_tpu_info().vmem_capacity_bytes
        if vmem <= 64 * 1024 * 1024:
            # v7x-class core: half the VMEM of v5e/v6e but ~2.3x v6e's HBM BW,
            # so a larger lane tile is needed to hide the per-step overhead.
            return 65536
    except Exception:
        pass
    return 32768  # v5e/v6e: ~5 MiB double-buffered, well inside scoped VMEM.


def _pick_tiling(B, batch_tile):
    """Returns (batch_tile, B_pad) with B_pad a multiple of batch_tile."""
    B_pad0 = _round_up(B, LANE)
    if batch_tile is not None:
        batch_tile = _round_up(batch_tile, LANE)
        num_tiles = pl.cdiv(B_pad0, batch_tile)
    else:
        target = _default_target_tile()
        num_tiles = max(1, pl.cdiv(B_pad0, target))
        if B_pad0 >= 2 * LANE:
            # >=2 grid steps so the "parallel" batch axis can shard across
            # v7x's two TensorCores (harmless elsewhere).
            num_tiles = max(num_tiles, 2)
        batch_tile = _round_up(pl.cdiv(B_pad0, num_tiles), LANE)
    return batch_tile, num_tiles * batch_tile


def mlp_forward(x, w1, b1, w2, b2, *, batch_tile=None,
                feature_major_residuals=False):
    """Forward pass. PyTorch nn.Linear layouts:
       x: (B, 2), w1: (8, 2), b1: (8,), w2: (1, 8), b2: (1,).
       Returns (output (B,1), hidden1, hidden2); residuals are (B,8) by
       default (PyTorch layout) or (8,B) when feature_major_residuals=True
       (saves a full extra HBM pass for memory-bound large batches)."""
    B, K = x.shape
    H = w1.shape[0]
    O = w2.shape[0]

    batch_tile, B_pad = _pick_tiling(B, batch_tile)

    # Pad first, then transpose: one cheap copy of the tiny (B, 2) input.
    xT = jnp.pad(x, ((0, B_pad - B), (0, 0))).T            # (2, B_pad)
    b1c = b1.reshape(H, 1)                                  # (8, 1)
    w2c = w2.T                                              # (8, 1) column
    b2s = b2.reshape(1, 1)                                  # scalar for SMEM

    grid = (B_pad // batch_tile,)
    # Memory-bound op: ~19 f32 moved and ~34 flops per batch element.
    cost = pl.CostEstimate(flops=34 * B_pad, transcendentals=0,
                           bytes_accessed=76 * B_pad + 4 * (H * K + H + H * O + O))

    out_T, h1_T, h2_T = pl.pallas_call(
        mlp_kernel,
        out_shape=(
            jax.ShapeDtypeStruct((O, B_pad), x.dtype),
            jax.ShapeDtypeStruct((H, B_pad), x.dtype),
            jax.ShapeDtypeStruct((H, B_pad), x.dtype),
        ),
        grid=grid,
        in_specs=[
            pl.BlockSpec((K, batch_tile), lambda i: (0, i)),      # x^T batch tile
            pl.BlockSpec((H, K), lambda i: (0, 0)),               # W1, resident
            pl.BlockSpec((H, 1), lambda i: (0, 0)),               # b1, resident
            pl.BlockSpec((H, O), lambda i: (0, 0)),               # W2 col, resident
            pl.BlockSpec(memory_space=pltpu.MemorySpace.SMEM),    # b2 scalar
        ],
        out_specs=(
            pl.BlockSpec((O, batch_tile), lambda i: (0, i)),
            pl.BlockSpec((H, batch_tile), lambda i: (0, i)),
            pl.BlockSpec((H, batch_tile), lambda i: (0, i)),
        ),
        compiler_params=pltpu.CompilerParams(
            dimension_semantics=("parallel",),
        ),
        cost_estimate=cost,
    )(xT, w1, b1c, w2c, b2s)

    out = out_T[:, :B].T                   # (B, 1): free reshape of a 1-row array
    if feature_major_residuals:
        return out, h1_T[:, :B], h2_T[:, :B]          # (8, B), no extra HBM pass
    # PyTorch layout (costs one extra XLA transpose pass over h1/h2).
    return out, h1_T[:, :B].T, h2_T[:, :B].T


def init_params(key):
    # Deterministic init mimicking nn.Linear's uniform(-1/sqrt(fan_in), +...),
    # stored in PyTorch layout: weight (out, in), bias (out,).
    k1, k2, k3, k4 = jax.random.split(key, 4)
    bound1 = 1.0 / jnp.sqrt(2.0)
    bound2 = 1.0 / jnp.sqrt(8.0)
    w1 = jax.random.uniform(k1, (8, 2), jnp.float32, -bound1, bound1)
    b1 = jax.random.uniform(k2, (8,), jnp.float32, -bound1, bound1)
    w2 = jax.random.uniform(k3, (1, 8), jnp.float32, -bound2, bound2)
    b2 = jax.random.uniform(k4, (1,), jnp.float32, -bound2, bound2)
    return w1, b1, w2, b2


if __name__ == "__main__":
    key = jax.random.PRNGKey(0)
    w1, b1, w2, b2 = init_params(key)

    # Same data as the PyTorch script: batch=4, in_features=2.
    x = jnp.array([[1.0, 2.0], [3.0, 4.0], [5.0, 6.0], [7.0, 8.0]],
                  dtype=jnp.float32)

    # Default: exact PyTorch layouts/semantics.
    out, h1, h2 = mlp_forward(x, w1, b1, w2, b2)
    out, h1, h2 = jax.block_until_ready((out, h1, h2))

    # Pure-JAX reference (PyTorch semantics: y = x @ W^T + b).
    h1_ref = x @ w1.T + b1
    h2_ref = jnp.maximum(h1_ref, 0.0)
    out_ref = h2_ref @ w2.T + b2

    assert out.shape == (4, 1) and h1.shape == (4, 8) and h2.shape == (4, 8)
    assert jnp.allclose(h1, h1_ref, atol=1e-5), (h1, h1_ref)
    assert jnp.allclose(h2, h2_ref, atol=1e-5), (h2, h2_ref)
    assert jnp.allclose(out, out_ref, atol=1e-5), (out, out_ref)

    # Fast-path variant: residuals returned feature-major (no extra HBM pass).
    out_f, h1_f, h2_f = mlp_forward(x, w1, b1, w2, b2,
                                    feature_major_residuals=True)
    out_f, h1_f, h2_f = jax.block_until_ready((out_f, h1_f, h2_f))
    assert jnp.allclose(out_f, out_ref, atol=1e-5)
    assert jnp.allclose(h1_f.T, h1_ref, atol=1e-5)
    assert jnp.allclose(h2_f.T, h2_ref, atol=1e-5)

    print("KERNEL_OK")
</pallas_src>

<mosaic_0001>
module attributes {stable_mosaic.version = 11 : i64} {
  func.func @mlp_kernel(%arg0: i32, %arg1: memref<2x128xf32, #tpu.memory_space<vmem>>, %arg2: memref<8x2xf32, #tpu.memory_space<vmem>>, %arg3: memref<8x1xf32, #tpu.memory_space<vmem>>, %arg4: memref<8x1xf32, #tpu.memory_space<vmem>>, %arg5: memref<1x1xf32, #tpu.memory_space<smem>>, %arg6: memref<1x128xf32, #tpu.memory_space<vmem>>, %arg7: memref<8x128xf32, #tpu.memory_space<vmem>>, %arg8: memref<8x128xf32, #tpu.memory_space<vmem>>) attributes {dimension_semantics = [#tpu.dimension_semantics<parallel>], iteration_bounds = array<i64: 1>, scalar_prefetch = 0 : i64, scratch_operands = 0 : i64, tpu.core_type = #tpu.core_type<tc>, window_params = [{transform_indices = @transform_0, window_bounds = array<i64: 2, 128>}, {pipeline_mode = #tpu.pipeline_mode<synchronous>, transform_indices = @transform_1, window_bounds = array<i64: 8, 2>}, {pipeline_mode = #tpu.pipeline_mode<synchronous>, transform_indices = @transform_2, window_bounds = array<i64: 8, 1>}, {pipeline_mode = #tpu.pipeline_mode<synchronous>, transform_indices = @transform_3, window_bounds = array<i64: 8, 1>}, {transform_indices = @transform_4, window_bounds = array<i64: 1, 1>}, {transform_indices = @transform_5, window_bounds = array<i64: 1, 128>}, {transform_indices = @transform_6, window_bounds = array<i64: 8, 128>}, {transform_indices = @transform_7, window_bounds = array<i64: 8, 128>}]} {
    %c0 = arith.constant 0 : index
    %c0_0 = arith.constant 0 : index
    %0 = vector.load %arg1[%c0, %c0_0] : memref<2x128xf32, #tpu.memory_space<vmem>>, vector<2x128xf32>
    %c0_1 = arith.constant 0 : index
    %c0_2 = arith.constant 0 : index
    %1 = vector.load %arg2[%c0_1, %c0_2] : memref<8x2xf32, #tpu.memory_space<vmem>>, vector<8x2xf32>
    %c0_3 = arith.constant 0 : index
    %c0_4 = arith.constant 0 : index
    %2 = vector.load %arg3[%c0_3, %c0_4] : memref<8x1xf32, #tpu.memory_space<vmem>>, vector<8x1xf32>
    %3 = vector.extract_strided_slice %1 {offsets = [0, 0], sizes = [8, 1], strides = [1, 1]} : vector<8x2xf32> to vector<8x1xf32>
    %4 = vector.extract_strided_slice %0 {offsets = [0, 0], sizes = [1, 128], strides = [1, 1]} : vector<2x128xf32> to vector<1x128xf32>
    %5 = vector.broadcast %3 : vector<8x1xf32> to vector<8x128xf32>
    %6 = vector.broadcast %4 : vector<1x128xf32> to vector<8x128xf32>
    %7 = arith.mulf %5, %6 : vector<8x128xf32>
    %8 = vector.extract_strided_slice %1 {offsets = [0, 1], sizes = [8, 1], strides = [1, 1]} : vector<8x2xf32> to vector<8x1xf32>
    %9 = vector.extract_strided_slice %0 {offsets = [1, 0], sizes = [1, 128], strides = [1, 1]} : vector<2x128xf32> to vector<1x128xf32>
    %10 = vector.broadcast %8 : vector<8x1xf32> to vector<8x128xf32>
    %11 = vector.broadcast %9 : vector<1x128xf32> to vector<8x128xf32>
    %12 = arith.mulf %10, %11 : vector<8x128xf32>
    %13 = arith.addf %7, %12 : vector<8x128xf32>
    %14 = vector.broadcast %2 : vector<8x1xf32> to vector<8x128xf32>
    %15 = arith.addf %13, %14 : vector<8x128xf32>
    %cst = arith.constant 0.000000e+00 : f32
    %16 = vector.broadcast %cst : f32 to vector<8x128xf32>
    %17 = arith.maximumf %15, %16 : vector<8x128xf32>
    %c0_5 = arith.constant 0 : index
    %c0_6 = arith.constant 0 : index
    %18 = vector.load %arg7[%c0_5, %c0_6] : memref<8x128xf32, #tpu.memory_space<vmem>>, vector<8x128xf32>
    tpu.vector_store %arg7[%c0_5, %c0_6], %15 {strides = array<i32>} : memref<8x128xf32, #tpu.memory_space<vmem>>, vector<8x128xf32>,
    %c0_7 = arith.constant 0 : index
    %c0_8 = arith.constant 0 : index
    %19 = vector.load %arg8[%c0_7, %c0_8] : memref<8x128xf32, #tpu.memory_space<vmem>>, vector<8x128xf32>
    tpu.vector_store %arg8[%c0_7, %c0_8], %17 {strides = array<i32>} : memref<8x128xf32, #tpu.memory_space<vmem>>, vector<8x128xf32>,
    %c0_9 = arith.constant 0 : index
    %c0_10 = arith.constant 0 : index
    %20 = vector.load %arg4[%c0_9, %c0_10] : memref<8x1xf32, #tpu.memory_space<vmem>>, vector<8x1xf32>
    %21 = vector.broadcast %20 : vector<8x1xf32> to vector<8x128xf32>
    %22 = arith.mulf %21, %17 : vector<8x128xf32>
    %cst_11 = arith.constant dense<0.000000e+00> : vector<128xf32>
    %23 = vector.multi_reduction <add>, %22, %cst_11 [0] : vector<8x128xf32> to vector<128xf32>
    %24 = vector.shape_cast %23 : vector<128xf32> to vector<1x128xf32>
    %c0_12 = arith.constant 0 : index
    %c0_13 = arith.constant 0 : index
    %25 = memref.load %arg5[%c0_12, %c0_13] : memref<1x1xf32, #tpu.memory_space<smem>>
    %26 = vector.broadcast %25 : f32 to vector<1x128xf32>
    %27 = arith.addf %24, %26 : vector<1x128xf32>
    %c0_14 = arith.constant 0 : index
    %c0_15 = arith.constant 0 : index
    %28 = vector.load %arg6[%c0_14, %c0_15] : memref<1x128xf32, #tpu.memory_space<vmem>>, vector<1x128xf32>
    tpu.vector_store %arg6[%c0_14, %c0_15], %27 {strides = array<i32>} : memref<1x128xf32, #tpu.memory_space<vmem>>, vector<1x128xf32>,
    return
  }
  func.func @transform_0(%arg0: i32) -> (i32, i32) {
    %c0_i32 = arith.constant 0 : i32
    %c0_i32_0 = arith.constant 0 : i32
    return %c0_i32, %arg0 : i32, i32
  }
  func.func @transform_1(%arg0: i32) -> (i32, i32) {
    %c0_i32 = arith.constant 0 : i32
    %c0_i32_0 = arith.constant 0 : i32
    %c0_i32_1 = arith.constant 0 : i32
    return %c0_i32, %c0_i32_0 : i32, i32
  }
  func.func @transform_2(%arg0: i32) -> (i32, i32) {
    %c0_i32 = arith.constant 0 : i32
    %c0_i32_0 = arith.constant 0 : i32
    %c0_i32_1 = arith.constant 0 : i32
    return %c0_i32, %c0_i32_0 : i32, i32
  }
  func.func @transform_3(%arg0: i32) -> (i32, i32) {
    %c0_i32 = arith.constant 0 : i32
    %c0_i32_0 = arith.constant 0 : i32
    %c0_i32_1 = arith.constant 0 : i32
    return %c0_i32, %c0_i32_0 : i32, i32
  }
  func.func @transform_4(%arg0: i32) -> (i32, i32) {
    %c0_i32 = arith.constant 0 : i32
    %c0_i32_0 = arith.constant 0 : i32
    %c0_i32_1 = arith.constant 0 : i32
    return %c0_i32, %c0_i32_0 : i32, i32
  }
  func.func @transform_5(%arg0: i32) -> (i32, i32) {
    %c0_i32 = arith.constant 0 : i32
    %c0_i32_0 = arith.constant 0 : i32
    return %c0_i32, %arg0 : i32, i32
  }
  func.func @transform_6(%arg0: i32) -> (i32, i32) {
    %c0_i32 = arith.constant 0 : i32
    %c0_i32_0 = arith.constant 0 : i32
    return %c0_i32, %arg0 : i32, i32
  }
  func.func @transform_7(%arg0: i32) -> (i32, i32) {
    %c0_i32 = arith.constant 0 : i32
    %c0_i32_0 = arith.constant 0 : i32
    return %c0_i32, %arg0 : i32, i32
  }
}

</mosaic_0001>

<bundles_post_ra>
// kernel: tpu_custom_call.1
= control target key start
LH: loop header
LB: loop body
LE: loop exit
PB: predicated region body
PF: predicated region fallthrough
CT: control target
= control target key end

     0   :  { %14 = vsyncpa [#allocation4], 0  ;;  %v195_v2 = vmov 0   ;;  %s298_s0 = inlined_call_operand.vmem [shape: f32[2,128], index: 0, kind: input, shape index: {}]   ;;  %s299_s1 = inlined_call_operand.vmem [shape: f32[8,2], index: 1, kind: input, shape index: {}]   ;;  %s300_s2 = inlined_call_operand.vmem [shape: f32[8,1], index: 2, kind: input, shape index: {}]   ;;  %s301_s3 = inlined_call_operand.vmem [shape: f32[8,1], index: 3, kind: input, shape index: {}]   ;;  %s302_s4 = inlined_call_operand.<no memory space> [shape: f32[1,1], index: 4, kind: input, shape index: {}]   ;;  %s303_s5 = inlined_call_operand.hbm [shape: f32[1,128], index: 5, kind: output, shape index: {0}]   ;;  %s304_s6 = inlined_call_operand.hbm [shape: f32[8,128], index: 6, kind: output, shape index: {1}]   ;;  %s305_s7 = inlined_call_operand.hbm [shape: f32[8,128], index: 7, kind: output, shape index: {2}]  }
   0x1   :  { %v27_v0 = vld [vmem:[%s299_s1] sm:$0xff]  ;;  %121 = vset.pattern.permute.xlu0 %v195_v2  ;;  %123 = vset.pattern.permute.xlu1 %v195_v2 }
   0x2   :  { %v28_v1 = vld [vmem:[%s300_s2] sm:$0xff] }
   0x3   :  { %15 = vsyncpa [#allocation6], 0  ;;  %31 = vperm.xlu0 %121, %v27_v0   ;;  %51 = vperm.xlu1 %123, %v28_v1   ;;  %v58_v3 = vld [vmem:[%s301_s3] sm:$0xff]  ;;  %v196_v4 = vmov 1   ;;  %v34_v5 = vlaneseq  ;;  %s197_s3 = smov [#allocation5]   ;;  %s198_s8 = smov [#allocation7]  }
   0x4   :  { %v26_v9 = vld [vmem:[%s298_s0] sm:$0x3]  ;;  %s91_s30 = sshll.u32 %s197_s3, 4  ;;  %s101_s9 = sshll.u32 %s198_s8, 4  ;;  %s92_s30 = int_to_ptr.vmem [resolvable:$true] %s91_s30  ;;  %s252_s9 = int_to_ptr.vmem [resolvable:$true] %s101_s9 }
   0x5   :  { %v35_v6 = vshrl.u32 %v34_v5, 7  ;;  %s125_s0 = scalar_lea.vmem %s92_s30, 128  ;;  %p130_p1 = scmp.lt.s32.totalorder %s92_s30, %s92_s30 }
   0x6   :  { %p126_p0 = scmp.ne.s32.totalorder %s92_s30, %s125_s0  ;;  %p131_p2 = scmp.lt.s32.totalorder %s125_s0, %s125_s0 }
   0x7   :  { %122 = vset.pattern.permute.xlu0 %v196_v4  ;;  %61 = vperm.xlu1 %123, %v58_v3   ;;  %v36_v7 = vsub.s32 0, %v35_v6  ;;  %v45_v8 = vsub.s32 1, %v35_v6 }
   0x8   :  { %40 = vperm.xlu0 %122, %v27_v0   ;;  %p132_p3 = por %p131_p2, %p130_p1 }
   0x9   :  { %v37_v11 = vrot.slane %v26_v9, %v36_v7  ;;  %v46_v12 = vrot.slane %v26_v9, %v45_v8 }
   0xa   :  { %p133_p4 = pnand %p132_p3, %p126_p0 }
   0xc   :  { %124 = vset.pattern.permute.xlu0 %v195_v2 }
  0x82   :  { %v32_v10 = vpop.permute.xlu0 %31  ;;  %v52_v16 = vpop.permute.xlu1 %51 }
  0x83   :  { %v38_v14 = vmul.f32 %v37_v11, %v32_v10 }
  0x86   :  { %v62_v20 = vpop.permute.xlu1 %61 }
  0x87   :  { %v41_v13 = vpop.permute.xlu0 %40 }
  0x88   :  { %v47_v15 = vmul.f32 %v46_v12, %v41_v13 }
  0x8a   :  { %v48_v17 = vadd.f32 %v47_v15, %v38_v14 }
  0x8c   :  { %v54_v18 = vadd.f32 %v52_v16, %v48_v17 }
  0x8e   :  { %v55_v19 = vmax.f32 %v54_v18, 0.0  ;;  %56 = vst [vmem:[#allocation5] sm:$0xff] %v54_v18 }
  0x8f   :  { %136 = shalt.err (!%p133_p4)
}
  0x90   :  { %s137_s12 = scalar_lea.hbm %s304_s6, 128 }
  0x91   :  { %p138_p5 = scmp.ne.s32.totalorder %s304_s6, %s137_s12  ;;  %p141_p6 = scmp.lt.u32.totalorder %s137_s12, %s304_s6 }
  0x93   :  { %p143_p7 = pnand %p141_p6, %p138_p5 }
  0x95   :  { %146 = shalt.err (!%p143_p7)
}
  0x96   :  { %94 = dma.vmem_to_hbm [thread:$0]  %s92_s30, 128, %s304_s6, [#allocation6]   ;;  %v64_v21 = vmul.f32 %v62_v20, %v55_v19  ;;  %57 = vst [vmem:[#allocation7] sm:$0xff] %v55_v19 }
  0x97   :  { %s147_s19 = scalar_lea.vmem %s252_s9, 128  ;;  %p152_p9 = scmp.lt.s32.totalorder %s252_s9, %s252_s9 }
  0x98   :  { %p148_p8 = scmp.ne.s32.totalorder %s252_s9, %s147_s19  ;;  %p153_p10 = scmp.lt.s32.totalorder %s147_s19, %s147_s19 }
  0x9a   :  { %p154_p11 = por %p153_p10, %p152_p9 }
  0x9c   :  { %p155_p12 = pnand %p154_p11, %p148_p8 }
  0x9e   :  { %158 = shalt.err (!%p155_p12)
}
  0x9f   :  { %s159_s22 = scalar_lea.hbm %s305_s7, 128 }
  0xa0   :  { %p160_p13 = scmp.ne.s32.totalorder %s305_s7, %s159_s22  ;;  %p163_p0 = scmp.lt.u32.totalorder %s159_s22, %s305_s7 }
  0xa2   :  { %p165_p1 = pnand %p163_p0, %p160_p13 }
  0xa4   :  { %168 = shalt.err (!%p165_p1)
}
  0xa5   :  { %104 = dma.vmem_to_hbm [thread:$0]  %s252_s9, 128, %s305_s7, [#allocation6]   ;;  %v65_v22 = vrot.slane %v64_v21, 4  ;;  %v72_v27 = vstv %s302_s4 }
  0xa6   :  { %s199_s1 = smov [#allocation3]  }
  0xa7   :  { %v66_v23 = vadd.f32 %v65_v22, %v64_v21  ;;  %s81_s2 = sshll.u32 %s199_s1, 4  ;;  %s82_s2 = int_to_ptr.vmem [resolvable:$true] %s81_s2 }
  0xa8   :  { %s169_s3 = scalar_lea.vmem %s82_s2, 16  ;;  %s173_s30 = scalar_lea.vmem %s82_s2, 32 }
  0xa9   :  { %v67_v24 = vrot.slane %v66_v23, 2  ;;  %p170_p2 = scmp.ne.s32.totalorder %s82_s2, %s169_s3  ;;  %p174_p3 = scmp.lt.s32.totalorder %s82_s2, %s82_s2 }
  0xaa   :  { %p175_p4 = scmp.lt.s32.totalorder %s173_s30, %s169_s3 }
  0xab   :  { %v68_v25 = vadd.f32 %v67_v24, %v66_v23 }
  0xac   :  { %p176_p5 = por %p175_p4, %p174_p3 }
  0xad   :  { %v69_v26 = vrot.slane %v68_v25, 1 }
  0xae   :  { %p177_p6 = pnand %p176_p5, %p170_p2 }
  0xaf   :  { %v70_v28 = vadd.f32 %v69_v26, %v68_v25 }
  0xb1   :  { %v73_v29 = vadd.f32 %v72_v27, %v70_v28 }
  0xb3   :  { %74 = vst [vmem:[#allocation3] sm:$0x1] %v73_v29 }
  0xb4   :  { %180 = shalt.err (!%p177_p6)
}
  0xb5   :  { %s181_s9 = scalar_lea.hbm %s303_s5, 16 }
  0xb6   :  { %p182_p7 = scmp.ne.s32.totalorder %s303_s5, %s181_s9  ;;  %p185_p8 = scmp.lt.u32.totalorder %s181_s9, %s303_s5 }
  0xb8   :  { %p187_p9 = pnand %p185_p8, %p182_p7 }
  0xba   :  { %190 = shalt.err (!%p187_p9)
}
  0xbb   :  { %84 = dma.vmem_to_hbm [thread:$0]  %s82_s2, 16, %s303_s5, [#allocation4]  }
  0xbc   :  { %191 = dma.done.wait [#allocation4], 16  }
  0xbd   :  { %192 = vsyncadd [#allocation4], 4294967280 }
  0xbe   :  { %193 = dma.done.wait [#allocation6], 256  }
  0xbf   :  { %194 = vsyncadd [#allocation6], 4294967040 }
  0xc0   :  { %114 = vsyncpa [#allocation4], 1 }
  0xc1   :  { %115 = vsyncpa [#allocation6], 1 }

</bundles_post_ra>
